<compile_context>
chip_gen: v7x
topology: tpu7x:2x2x1
jax: 0.10.0
libtpu: 0.0.40
codegen_flags: <defaults>
</compile_context>

<pallas_src>
import functools

import numpy as np
import jax
import jax.numpy as jnp
from jax import lax
from jax.experimental import pallas as pl
from jax.experimental.pallas import tpu as pltpu

_MIB = 1024 * 1024


def _round_up(x, m):
    return ((x + m - 1) // m) * m


def _vmem_limit(est_bytes, lo=8 * _MIB, hi=64 * _MIB):
    """Explicit scoped-VMEM budget: 2x headroom over the block estimate,
    clamped to stay inside v7x's 64 MiB physical VMEM."""
    return int(min(max(2 * est_bytes, lo), hi))


def _largest_divisor_leq(n, target):
    t = min(n, target)
    while n % t:
        t -= 1
    return t


# ----------------------------------------------------------------------------
# Generic tiled linear kernel: y = x @ w + b.
# Grid = (col tiles, row tiles): row tile is the innermost (fastest) axis, so
# the (K, tv) weight tile is fetched once per column tile -> the whole weight
# matrix is streamed from HBM exactly once (mem-bound vocab projection).
# ----------------------------------------------------------------------------
def _linear_kernel(x_ref, w_ref, b_ref, o_ref):
    acc = jnp.dot(x_ref[...].astype(jnp.bfloat16), w_ref[...],
                  preferred_element_type=jnp.float32)
    o_ref[...] = (acc + b_ref[...]).astype(o_ref.dtype)


def linear(x, w, b, *, out_dtype=jnp.float32, tn_target=256, tv_target=512):
    """x: (N, K) f32/bf16; w: (K, V) bf16; b: (1, V) f32 -> (N, V) out_dtype."""
    N, K = x.shape
    V = w.shape[1]
    tn = min(tn_target, _round_up(N, 8))
    tv = min(tv_target, _round_up(V, 128))
    N_pad = _round_up(N, tn)
    V_pad = _round_up(V, tv)
    if N_pad != N:
        x = jnp.pad(x, ((0, N_pad - N), (0, 0)))
    if V_pad != V:
        w = jnp.pad(w, ((0, 0), (0, V_pad - V)))
        b = jnp.pad(b, ((0, 0), (0, V_pad - V)))
    n_row, n_col = N_pad // tn, V_pad // tv

    est = (2 * tn * K * x.dtype.itemsize          # x tiles (double buffered)
           + 2 * K * tv * w.dtype.itemsize        # w tiles
           + 2 * tv * b.dtype.itemsize            # bias tiles
           + 2 * tn * tv * jnp.dtype(out_dtype).itemsize)

    out = pl.pallas_call(
        _linear_kernel,
        out_shape=jax.ShapeDtypeStruct((N_pad, V_pad), out_dtype),
        grid=(n_col, n_row),                      # row tile innermost
        in_specs=[pl.BlockSpec((tn, K), lambda jc, ir: (ir, 0)),
                  pl.BlockSpec((K, tv), lambda jc, ir: (0, jc)),
                  pl.BlockSpec((1, tv), lambda jc, ir: (0, jc))],
        out_specs=pl.BlockSpec((tn, tv), lambda jc, ir: (ir, jc)),
        compiler_params=pltpu.CompilerParams(
            dimension_semantics=("parallel", "parallel"),
            vmem_limit_bytes=_vmem_limit(est)),
    )(x, w, b)
    return out[:N, :V]


# ----------------------------------------------------------------------------
# LSTM recurrence kernel.  Input-to-hidden gate pre-activations (gih, bf16)
# are precomputed outside; inside we only do h_prev @ w_hh + gih[t] per step.
# Grid = (batch tiles [parallel], time chunks [arbitrary]); within a chunk,
# h/c are fori_loop carries (vregs); VMEM scratch carries them across chunks.
# ----------------------------------------------------------------------------
def _sigmoid_tanh(x):
    # sigmoid(x) = 0.5*(tanh(0.5*x)+1): one EUP push instead of exp+reciprocal,
    # the rest goes to otherwise-idle VPU slots.
    return 0.5 * jnp.tanh(0.5 * x) + 0.5


def _lstm_rec_kernel(gih_ref, whh_ref, out_ref, hN_ref, cN_ref, h_sc, c_sc,
                     *, hid, unroll):
    chunk = pl.program_id(1)
    T = gih_ref.shape[0]                   # timesteps in this chunk (static)
    H = hid

    @pl.when(chunk == 0)
    def _():
        h_sc[...] = jnp.zeros_like(h_sc)
        c_sc[...] = jnp.zeros_like(c_sc)

    def step(t, carry):
        h_prev, c_prev = carry             # f32 carries
        # Single MXU push per timestep; bf16 operands, f32 accumulation.
        gates = (gih_ref[t].astype(jnp.float32)
                 + jnp.dot(h_prev.astype(jnp.bfloat16), whh_ref[...],
                           preferred_element_type=jnp.float32))
        # Gate column order is (i, f, o, g): one sigmoid over a contiguous
        # (B, 3H) slab and one tanh over (B, H).  Gate math stays f32.
        sig = _sigmoid_tanh(gates[:, :3 * H])
        g_g = jnp.tanh(gates[:, 3 * H:])
        i_g = sig[:, 0 * H:1 * H]
        f_g = sig[:, 1 * H:2 * H]
        o_g = sig[:, 2 * H:3 * H]
        c_new = f_g * c_prev + i_g * g_g
        h_new = o_g * jnp.tanh(c_new)
        out_ref[t] = h_new
        return h_new, c_new

    h_fin, c_fin = lax.fori_loop(0, T, step, (h_sc[...], c_sc[...]),
                                 unroll=unroll)

    # Carry h/c across chunk boundaries.
    h_sc[...] = h_fin
    c_sc[...] = c_fin

    # Only the final state matters; write it once (resident output blocks).
    @pl.when(chunk == pl.num_programs(1) - 1)
    def _():
        hN_ref[...] = h_fin
        cN_ref[...] = c_fin


def lstm_layer_recurrence(gih_seq, w_hh, *, t_chunk_target=8):
    """gih_seq: (S, B_pad, 4H) bf16 precomputed x@w_ih + b;  w_hh: (H, 4H) bf16."""
    S, B_pad, G = gih_seq.shape
    H = w_hh.shape[0]
    t_chunk = _largest_divisor_leq(S, t_chunk_target)
    n_chunks = S // t_chunk
    # Batch tiles are independent -> "parallel" axis (2 TCs on v7x).
    b_tile = B_pad // 2 if B_pad % 16 == 0 else B_pad
    n_b = B_pad // b_tile
    # Full unroll only for small H; partial unroll avoids vreg spills at H>=512.
    unroll = True if H <= 256 else 2

    kernel = functools.partial(_lstm_rec_kernel, hid=H, unroll=unroll)

    est = (2 * t_chunk * b_tile * G * gih_seq.dtype.itemsize   # gih blocks
           + H * G * w_hh.dtype.itemsize                       # w_hh (x1)
           + 2 * t_chunk * b_tile * H * 4                      # out blocks
           + 6 * b_tile * H * 4)                               # hN/cN/scratch

    def call(single_buffer_whh):
        whh_kwargs = {}
        if single_buffer_whh:
            # Constant index_map -> fetched once; second buffer is pure waste.
            whh_kwargs = dict(pipeline_mode=pl.Buffered(1))
        return pl.pallas_call(
            kernel,
            out_shape=(jax.ShapeDtypeStruct((S, B_pad, H), jnp.float32),
                       jax.ShapeDtypeStruct((B_pad, H), jnp.float32),
                       jax.ShapeDtypeStruct((B_pad, H), jnp.float32)),
            grid_spec=pltpu.PrefetchScalarGridSpec(
                num_scalar_prefetch=0,
                grid=(n_b, n_chunks),
                in_specs=[pl.BlockSpec((t_chunk, b_tile, G),
                                       lambda bi, c: (c, bi, 0)),
                          pl.BlockSpec((H, G), lambda bi, c: (0, 0),
                                       **whh_kwargs)],
                out_specs=[pl.BlockSpec((t_chunk, b_tile, H),
                                        lambda bi, c: (c, bi, 0)),
                           pl.BlockSpec((b_tile, H), lambda bi, c: (bi, 0)),
                           pl.BlockSpec((b_tile, H), lambda bi, c: (bi, 0))],
                scratch_shapes=[pltpu.VMEM((b_tile, H), jnp.float32),
                                pltpu.VMEM((b_tile, H), jnp.float32)]),
            compiler_params=pltpu.CompilerParams(
                dimension_semantics=("parallel", "arbitrary"),
                vmem_limit_bytes=_vmem_limit(est)),
        )(gih_seq, w_hh)

    try:
        return call(True)          # single-buffered constant w_hh block
    except Exception:              # fallback if Buffered(1) is rejected
        return call(False)


# ----------------------------------------------------------------------------
# Full RNNLM forward (dropout p=0 -> identity, matching the module default).
# ----------------------------------------------------------------------------
def rnnlm_forward(x, params):
    S, B = x.shape
    B_pad = _round_up(B, 8)                # pad batch to a sublane multiple

    # Embedding lookup (gather) is plain-JAX glue.
    # TODO(synk): dropout is identity at the module default p=0.
    embedded = jnp.take(params["embedding"], x, axis=0)        # (S, B, emb)
    if B_pad != B:
        embedded = jnp.pad(embedded, ((0, 0), (0, B_pad - B), (0, 0)))

    layer_in = embedded                                        # (S, B_pad, D)
    h_list, c_list = [], []
    for lw in params["lstm"]:
        D = layer_in.shape[-1]
        G = lw["w_ih"].shape[1]
        # Hoisted input->hidden matmul: one large MXU-friendly tiled matmul.
        # Stored in bf16 to halve the (S, B, 4H) HBM round trip.
        gih = linear(layer_in.reshape(S * B_pad, D), lw["w_ih"], lw["b"],
                     out_dtype=jnp.bfloat16)
        gih = gih.reshape(S, B_pad, G)
        out_seq, h_n, c_n = lstm_layer_recurrence(gih, lw["w_hh"])
        h_list.append(h_n[:B])
        c_list.append(c_n[:B])
        layer_in = out_seq

    hidden = jnp.stack(h_list, axis=0)                         # (L, B, H)
    cell = jnp.stack(c_list, axis=0)                           # (L, B, H)

    out = layer_in[:, :B, :]                                   # drop pad rows
    H = out.shape[-1]
    out_flat = out.reshape(S * B, H)                           # (-1, hid)
    logits = linear(out_flat, params["lin_w"], params["lin_b"],
                    out_dtype=jnp.float32)                     # (S*B, vocab)
    return logits, (hidden, cell)


# ----------------------------------------------------------------------------
# Pure-JAX reference (same math, f32) for a sanity check.
# ----------------------------------------------------------------------------
def rnnlm_reference(x, params):
    embedded = jnp.take(params["embedding"], x, axis=0)
    layer_in = embedded
    h_list, c_list = [], []
    for lw in params["lstm"]:
        w_ih = lw["w_ih"].astype(jnp.float32)
        w_hh = lw["w_hh"].astype(jnp.float32)
        bias = lw["b"]
        H = w_hh.shape[0]
        B = layer_in.shape[1]
        h = jnp.zeros((B, H), jnp.float32)
        c = jnp.zeros((B, H), jnp.float32)
        outs = []
        for t in range(layer_in.shape[0]):
            gates = layer_in[t] @ w_ih + h @ w_hh + bias
            # params are stored with gate columns in (i, f, o, g) order.
            i_g = jax.nn.sigmoid(gates[:, 0 * H:1 * H])
            f_g = jax.nn.sigmoid(gates[:, 1 * H:2 * H])
            o_g = jax.nn.sigmoid(gates[:, 2 * H:3 * H])
            g_g = jnp.tanh(gates[:, 3 * H:4 * H])
            c = f_g * c + i_g * g_g
            h = o_g * jnp.tanh(c)
            outs.append(h)
        layer_in = jnp.stack(outs, axis=0)
        h_list.append(h)
        c_list.append(c)
    S, B, H = layer_in.shape
    logits = (layer_in.reshape(S * B, H) @ params["lin_w"].astype(jnp.float32)
              + params["lin_b"])
    return logits, (jnp.stack(h_list, 0), jnp.stack(c_list, 0))


def _ifgo_to_ifog(w, axis):
    """Permute PyTorch gate order (i, f, g, o) -> kernel order (i, f, o, g)."""
    i, f, g, o = jnp.split(w, 4, axis=axis)
    return jnp.concatenate([i, f, o, g], axis=axis)


def make_params(key, vocab, emb_dim, hid_dim, n_layers):
    keys = jax.random.split(key, 3 + 4 * n_layers)
    params = {
        "embedding": jax.random.normal(keys[0], (vocab, emb_dim),
                                       jnp.float32) * 0.1,
        # Weights stored bf16 (MXU-native), biases/embedding stay f32.
        "lin_w": (jax.random.normal(keys[1], (hid_dim, vocab),
                                    jnp.float32) * 0.1).astype(jnp.bfloat16),
        "lin_b": jax.random.normal(keys[2], (1, vocab), jnp.float32) * 0.1,
        "lstm": [],
    }
    for layer in range(n_layers):
        in_dim = emb_dim if layer == 0 else hid_dim
        k = keys[3 + 4 * layer: 3 + 4 * (layer + 1)]
        # PyTorch stores weight_ih as (4H, in) with gate order (i,f,g,o); we
        # keep the transposed (in, 4H) layout and permute columns to (i,f,o,g).
        w_ih = jax.random.normal(k[0], (in_dim, 4 * hid_dim), jnp.float32) * 0.1
        w_hh = jax.random.normal(k[1], (hid_dim, 4 * hid_dim), jnp.float32) * 0.1
        b_ih = jax.random.normal(k[2], (4 * hid_dim,), jnp.float32) * 0.1
        b_hh = jax.random.normal(k[3], (4 * hid_dim,), jnp.float32) * 0.1
        params["lstm"].append({
            "w_ih": _ifgo_to_ifog(w_ih, axis=1).astype(jnp.bfloat16),
            "w_hh": _ifgo_to_ifog(w_hh, axis=1).astype(jnp.bfloat16),
            "b": _ifgo_to_ifog((b_ih + b_hh).reshape(1, 4 * hid_dim), axis=1),
        })
    return params


if __name__ == "__main__":
    vocab, emb_dim, hid_dim, n_layers = 128, 32, 32, 2
    seq_len, batch = 8, 2

    key = jax.random.PRNGKey(0)
    pkey, xkey = jax.random.split(key)
    params = make_params(pkey, vocab, emb_dim, hid_dim, n_layers)

    x = jax.random.randint(xkey, (seq_len, batch), 0, vocab, dtype=jnp.int32)

    logits, (hidden, cell) = rnnlm_forward(x, params)
    jax.block_until_ready((logits, hidden, cell))

    ref_logits, (ref_h, ref_c) = rnnlm_reference(x, params)
    assert logits.shape == (seq_len * batch, vocab)
    assert hidden.shape == (n_layers, batch, hid_dim)
    assert cell.shape == (n_layers, batch, hid_dim)
    # Tolerance loosened vs the pure-f32 version: activations/intermediates
    # are rounded to bf16 at the MXU boundaries (accumulation stays f32).
    np.testing.assert_allclose(np.asarray(logits), np.asarray(ref_logits),
                               rtol=2e-2, atol=2e-2)
    np.testing.assert_allclose(np.asarray(hidden), np.asarray(ref_h),
                               rtol=2e-2, atol=2e-2)
    np.testing.assert_allclose(np.asarray(cell), np.asarray(ref_c),
                               rtol=2e-2, atol=2e-2)

    print("KERNEL_OK")
</pallas_src>

<mosaic_0001>
module attributes {stable_mosaic.version = 11 : i64} {
  func.func @_linear_kernel(%arg0: i32, %arg1: i32, %arg2: memref<64x32xf32, #tpu.memory_space<vmem>>, %arg3: memref<32x128xbf16, #tpu.memory_space<vmem>>, %arg4: memref<1x128xf32, #tpu.memory_space<vmem>>, %arg5: memref<64x128xbf16, #tpu.memory_space<vmem>>) attributes {dimension_semantics = [#tpu.dimension_semantics<parallel>, #tpu.dimension_semantics<parallel>], iteration_bounds = array<i64: 1, 1>, scalar_prefetch = 0 : i64, scratch_operands = 0 : i64, tpu.core_type = #tpu.core_type<tc>, window_params = [{transform_indices = @transform_0, window_bounds = array<i64: 64, 32>}, {transform_indices = @transform_1, window_bounds = array<i64: 32, 128>}, {transform_indices = @transform_2, window_bounds = array<i64: 1, 128>}, {transform_indices = @transform_3, window_bounds = array<i64: 64, 128>}]} {
    %c0 = arith.constant 0 : index
    %c0_0 = arith.constant 0 : index
    %0 = vector.load %arg2[%c0, %c0_0] : memref<64x32xf32, #tpu.memory_space<vmem>>, vector<64x32xf32>
    %1 = arith.truncf %0 : vector<64x32xf32> to vector<64x32xbf16>
    %c0_1 = arith.constant 0 : index
    %c0_2 = arith.constant 0 : index
    %2 = vector.load %arg3[%c0_1, %c0_2] : memref<32x128xbf16, #tpu.memory_space<vmem>>, vector<32x128xbf16>
    %cst = arith.constant dense<0.000000e+00> : vector<64x128xf32>
    %3 = tpu.matmul %1, %2, %cst {dimension_numbers = #tpu.dot_dimension_numbers<[1], [0], [0], [1], [0, 0, 1, 1], [], []>} : vector<64x32xbf16>, vector<32x128xbf16>, vector<64x128xf32> -> vector<64x128xf32>
    %c0_3 = arith.constant 0 : index
    %c0_4 = arith.constant 0 : index
    %4 = vector.load %arg4[%c0_3, %c0_4] : memref<1x128xf32, #tpu.memory_space<vmem>>, vector<1x128xf32>
    %5 = vector.broadcast %4 : vector<1x128xf32> to vector<64x128xf32>
    %6 = arith.addf %3, %5 : vector<64x128xf32>
    %7 = arith.truncf %6 : vector<64x128xf32> to vector<64x128xbf16>
    %c0_5 = arith.constant 0 : index
    %c0_6 = arith.constant 0 : index
    %8 = vector.load %arg5[%c0_5, %c0_6] : memref<64x128xbf16, #tpu.memory_space<vmem>>, vector<64x128xbf16>
    tpu.vector_store %arg5[%c0_5, %c0_6], %7 {strides = array<i32>} : memref<64x128xbf16, #tpu.memory_space<vmem>>, vector<64x128xbf16>,
    return
  }
  func.func @transform_0(%arg0: i32, %arg1: i32) -> (i32, i32) {
    %c0_i32 = arith.constant 0 : i32
    %c0_i32_0 = arith.constant 0 : i32
    return %arg1, %c0_i32 : i32, i32
  }
  func.func @transform_1(%arg0: i32, %arg1: i32) -> (i32, i32) {
    %c0_i32 = arith.constant 0 : i32
    %c0_i32_0 = arith.constant 0 : i32
    return %c0_i32, %arg0 : i32, i32
  }
  func.func @transform_2(%arg0: i32, %arg1: i32) -> (i32, i32) {
    %c0_i32 = arith.constant 0 : i32
    %c0_i32_0 = arith.constant 0 : i32
    return %c0_i32, %arg0 : i32, i32
  }
  func.func @transform_3(%arg0: i32, %arg1: i32) -> (i32, i32) {
    %c0_i32 = arith.constant 0 : i32
    return %arg1, %arg0 : i32, i32
  }
}

</mosaic_0001>

<bundles_post_ra>
// kernel: tpu_custom_call.1
= control target key start
LH: loop header
LB: loop body
LE: loop exit
PB: predicated region body
PF: predicated region fallthrough
CT: control target
= control target key end

     0   :  { %vm51_vm0 = vcmask 261120   ;;  %s354_s0 = inlined_call_operand.vmem [shape: f32[64,32], index: 0, kind: input, shape index: {}]   ;;  %s355_s1 = inlined_call_operand.vmem [shape: bf16[32,128], index: 1, kind: input, shape index: {}]   ;;  %s356_s2 = inlined_call_operand.vmem [shape: f32[1,128], index: 2, kind: input, shape index: {}]   ;;  %s357_s3 = inlined_call_operand.hbm [shape: bf16[64,128], index: 3, kind: output, shape index: {}]  }
   0x1   :  { %v256_v0 = vld [vmem:[%s355_s1] sm:$0xff]   ;;  %v257_v1 = vld [vmem:[%s355_s1 + $0x8] sm:$0xff]   ;;  %v18_v7 = vld [vmem:[%s354_s0 + $0x10] sm:$0xff] }
   0x2   :  { %237 = vmatprep.subr.bf16.mxu0 %v256_v0  ;;  %249 = vmatprep.subr.bf16.mxu1 %v256_v0  ;;  %v16_v2 = vld [vmem:[%s354_s0] sm:$0xff]  ;;  %v17_v3 = vld [vmem:[%s354_s0 + $0x8] sm:$0xff]  ;;  %v19_v8 = vld [vmem:[%s354_s0 + $0x18] sm:$0xff] }
   0x3   :  { %v20_v4 = vld [vmem:[%s354_s0 + $0x20] sm:$0xff]  ;;  %238 = vmatpush3.bf16.msra.mxu0 %v256_v0  ;;  %251 = vmatpush3.bf16.msra.mxu1 %v256_v0  ;;  %v24_v5 = vpack.c.bf16 %v17_v3, %v16_v2  ;;  %v21_v6 = vld [vmem:[%s354_s0 + $0x28] sm:$0xff]  ;;  %v22_v10 = vld [vmem:[%s354_s0 + $0x30] sm:$0xff] }
   0x4   :  { %239 = vmatprep.subr.bf16.mxu0 %v257_v1  ;;  %250 = vmatprep.subr.bf16.mxu1 %v257_v1  ;;  %v26_v9 = vpack.c.bf16 %v21_v6, %v20_v4  ;;  %v23_v11 = vld [vmem:[%s354_s0 + $0x38] sm:$0xff] }
   0x5   :  { %8 = vsyncpa [#allocation3], 0  ;;  %241 = vmatprep.mubr.msk.bf16.mxu0 %vm51_vm0, %v24_v5  ;;  %v25_v12 = vpack.c.bf16 %v19_v8, %v18_v7  ;;  %v27_v13 = vpack.c.bf16 %v23_v11, %v22_v10  ;;  %v185_v15 = vld [vmem:[%s356_s2] ss:$0 sm:$0xff]  ;;  %s282_s0 = smov [#allocation2]  }
   0x6   :  { %245 = vmatprep.mubr.msk.bf16.mxu1 %vm51_vm0, %v26_v9  ;;  %s174_s6 = sshll.u32 %s282_s0, 4  ;;  %s175_s6 = int_to_ptr.vmem [resolvable:$true] %s174_s6 }
   0x7   :  { %240 = vmatpush3.bf16.msra.mxu0 %v257_v1  ;;  %252 = vmatpush3.bf16.msra.mxu1 %v257_v1  ;;  %s258_s2 = scalar_lea.vmem %s175_s6, 512  ;;  %p263_p1 = scmp.lt.s32.totalorder %s175_s6, %s175_s6 }
   0x8   :  { %p259_p0 = scmp.ne.s32.totalorder %s175_s6, %s258_s2  ;;  %p264_p2 = scmp.lt.s32.totalorder %s258_s2, %s258_s2 }
   0xa   :  { %242 = vmatmul.mubr.msk.bf16.vlgmr.msra.gmra.mrb[0].mxu0 %vm51_vm0, %v25_v12  ;;  %246 = vmatmul.mubr.msk.bf16.vlgmr.msra.gmra.mrb[0].mxu1 %vm51_vm0, %v27_v13  ;;  %p265_p3 = por %p264_p2, %p263_p1 }
   0xc   :  { %p266_p4 = pnand %p265_p3, %p259_p0 }
  0xdd   :  { %v243_v14 = vpop.f32.mrb[0].mxu0  ;;  %v247_v16 = vpop.f32.mrb[0].mxu1 }
  0xde   :  { %v98_v17 = vpop.f32.mrb[1].mxu0  ;;  %v114_v18 = vpop.f32.mrb[1].mxu1  ;;  %v107_v21 = vadd.f32 %v243_v14, %v185_v15  ;;  %v123_v22 = vadd.f32 %v247_v16, %v185_v15 }
  0xdf   :  { %v244_v19 = vpop.f32.mrb[2].mxu0  ;;  %v248_v20 = vpop.f32.mrb[2].mxu1  ;;  %v99_v27 = vadd.f32 %v185_v15, %v98_v17  ;;  %v115_v28 = vadd.f32 %v185_v15, %v114_v18 }
  0xe0   :  { %v110_v23 = vadd.f32 %v244_v19, %v185_v15  ;;  %v126_v24 = vadd.f32 %v248_v20, %v185_v15  ;;  %v101_v25 = vpop.f32.mrb[3].mxu0  ;;  %v117_v26 = vpop.f32.mrb[3].mxu1 }
  0xe1   :  { %v102_v29 = vadd.f32 %v185_v15, %v101_v25  ;;  %v118_v30 = vadd.f32 %v185_v15, %v117_v26 }
  0xe2   :  { %v216_v31 = vpack.c.bf16 %v110_v23, %v107_v21  ;;  %v226_v32 = vpack.c.bf16 %v126_v24, %v123_v22 }
  0xe3   :  { %v211_v33 = vpack.c.bf16 %v102_v29, %v99_v27  ;;  %v221_v34 = vpack.c.bf16 %v118_v30, %v115_v28 }
  0xe4   :  { %228 = vst [vmem:[#allocation2 + $0x8] sm:$0xff] %v216_v31   ;;  %230 = vst [vmem:[#allocation2 + $0x18] sm:$0xff] %v226_v32  }
  0xe5   :  { %212 = vst [vmem:[#allocation2] sm:$0xff] %v211_v33   ;;  %229 = vst [vmem:[#allocation2 + $0x10] sm:$0xff] %v221_v34  }
  0xe6   :  { %269 = shalt.err (!%p266_p4)
}
  0xe7   :  { %s270_s9 = scalar_lea.hbm %s357_s3, 512 }
  0xe8   :  { %p271_p5 = scmp.ne.s32.totalorder %s357_s3, %s270_s9  ;;  %p274_p6 = scmp.lt.u32.totalorder %s270_s9, %s357_s3 }
  0xea   :  { %p276_p7 = pnand %p274_p6, %p271_p5 }
  0xec   :  { %279 = shalt.err (!%p276_p7)
}
  0xed   :  { %s283_s14 = smov 64   ;;  %s284_s15 = smov 4  }
  0xee   :  { %180 = dma.vmem_to_hbm [thread:$0]  %s175_s6, 512, %s357_s3, [#allocation3], %s283_s14, %s283_s14, %s284_s15  }
  0xef   :  { %280 = dma.done.wait [#allocation3], 512  }
  0xf0   :  { %281 = vsyncadd [#allocation3], 4294966784 }
  0xf1   :  { %184 = vsyncpa [#allocation3], 1 }

</bundles_post_ra>
